<compile_context>
chip_gen: v6e
topology: v6e:2x2x1
jax: 0.10.0
libtpu: 0.0.40
codegen_flags: <defaults>
</compile_context>

<pallas_src>
import jax
import jax.numpy as jnp
from jax.experimental import pallas as pl
from jax.experimental.pallas import tpu as pltpu  # noqa: F401  (TPU backend assumed)


def _attention_kernel(h_ref, enc_ref, w_ref, b_ref, v_ref, attn_ref):
    # h_ref    : (1, H)   decoder hidden state (batch = 1)
    # enc_ref  : (L, H)   encoder outputs
    # w_ref    : (2H, H)  attn Linear weight, pre-transposed & fused:
    #                     rows [0:H]  multiply the hidden state,
    #                     rows [H:2H] multiply the encoder outputs
    # b_ref    : (1, H)   attn Linear bias
    # v_ref    : (1, H)   v Linear weight (row vector, no bias)
    # attn_ref : (1, L)   lane-dense softmax attention weights (output)
    H = h_ref.shape[-1]
    h = h_ref[...]
    enc = enc_ref[...]

    # energy = tanh(cat(hidden_repeated, encoder_outputs) @ W_attn.T + b)
    # computed as two matmuls against the fused, pre-transposed weight slab
    # (static ref slices are free; no lane-dim concat needed).
    h_proj = jnp.dot(h, w_ref[:H, :], preferred_element_type=jnp.float32)     # (1, H)
    e_proj = jnp.dot(enc, w_ref[H:, :], preferred_element_type=jnp.float32)   # (L, H)
    energy = jnp.tanh(h_proj + e_proj + b_ref[...])                           # (L, H)

    # scores = v(energy), contracted over H so the result is lane-major (1, L)
    # (MXU contraction with rhs-transposed layout; keeps softmax on the lane axis).
    scores = jax.lax.dot_general(
        v_ref[...], energy, (((1,), (1,)), ((), ())),
        preferred_element_type=jnp.float32)                                   # (1, L)

    # softmax over dim=1 (lane axis) -> lane-dense store
    m = jnp.max(scores, axis=-1, keepdims=True)
    p = jnp.exp(scores - m)
    attn_ref[...] = p / jnp.sum(p, axis=-1, keepdims=True)


def prepare_params(params):
    """One-time weight preparation (hoisted out of the per-call decode path)."""
    H = params["attn_b"].shape[0]
    return dict(
        w_attn=jnp.asarray(params["attn_w"], jnp.float32).T,          # (2H, H)
        b_attn=jnp.asarray(params["attn_b"], jnp.float32).reshape(1, H),
        v=jnp.asarray(params["v_w"], jnp.float32),                     # (1, H)
    )


@jax.jit
def attention_forward(prepared, hidden, encoder_outputs):
    """hidden: (1, 1, H); encoder_outputs: (L, H)  ->  attention weights (1, L)."""
    H = prepared["b_attn"].shape[-1]
    L = encoder_outputs.shape[0]
    h = hidden.reshape(1, H).astype(jnp.float32)
    enc = encoder_outputs.astype(jnp.float32)

    inputs = (h, enc, prepared["w_attn"], prepared["b_attn"], prepared["v"])

    def spec(x):
        n = x.ndim
        return pl.BlockSpec(x.shape, lambda i, n=n: (0,) * n)

    attn = pl.pallas_call(
        _attention_kernel,
        grid=(1,),
        in_specs=[spec(x) for x in inputs],
        out_specs=pl.BlockSpec((1, L), lambda i: (0, 0)),
        out_shape=jax.ShapeDtypeStruct((1, L), jnp.float32),
    )(*inputs)
    return attn


def init_params(key, hidden_size):
    """PyTorch-style Linear init for attn (2H -> H) and v (H -> 1, no bias)."""
    H = hidden_size
    k1, k2, k3 = jax.random.split(key, 3)

    def u(k, shape, fan_in):
        bound = 1.0 / jnp.sqrt(jnp.float32(fan_in))
        return jax.random.uniform(k, shape, jnp.float32, -bound, bound)

    return dict(
        attn_w=u(k1, (H, 2 * H), 2 * H),
        attn_b=u(k2, (H,), 2 * H),
        v_w=u(k3, (1, H), H),
    )


def reference_forward(params, hidden, encoder_outputs):
    """Pure-JAX reference mirroring the PyTorch Attention.forward."""
    H = hidden.shape[-1]
    L = encoder_outputs.shape[0]
    hi = jax.lax.Precision.HIGHEST
    hidden_rep = jnp.broadcast_to(hidden, (L, 1, H)).transpose(1, 0, 2)       # (1, L, H)
    enc = encoder_outputs[None]                                               # (1, L, H)
    cat = jnp.concatenate([hidden_rep, enc], axis=2)                          # (1, L, 2H)
    energy = jnp.tanh(jnp.dot(cat, params["attn_w"].T, precision=hi) + params["attn_b"])
    scores = jnp.dot(energy, params["v_w"].T, precision=hi)[..., 0]           # (1, L)
    return jax.nn.softmax(scores, axis=1)


if __name__ == "__main__":
    H, L = 32, 8   # hidden_size, encoder max_len

    key = jax.random.PRNGKey(0)
    kp, kh, ke = jax.random.split(key, 3)
    params = init_params(kp, H)
    prepared = prepare_params(params)                         # one-time weight prep
    hidden = jax.random.normal(kh, (1, 1, H), jnp.float32)    # GRU hidden (layers=1, batch=1)
    encoder_outputs = jax.random.normal(ke, (L, H), jnp.float32)

    attn_w = attention_forward(prepared, hidden, encoder_outputs)
    jax.block_until_ready(attn_w)

    ref = reference_forward(params, hidden, encoder_outputs)
    assert attn_w.shape == (1, L)
    assert jnp.allclose(attn_w, ref, atol=1e-4, rtol=1e-4)
    assert jnp.allclose(jnp.sum(attn_w), 1.0, atol=1e-5)
    print("KERNEL_OK")
</pallas_src>

<mosaic_0001>
module attributes {stable_mosaic.version = 11 : i64} {
  func.func @_attention_kernel(%arg0: i32, %arg1: memref<1x32xf32, #tpu.memory_space<vmem>>, %arg2: memref<8x32xf32, #tpu.memory_space<vmem>>, %arg3: memref<64x32xf32, #tpu.memory_space<vmem>>, %arg4: memref<1x32xf32, #tpu.memory_space<vmem>>, %arg5: memref<1x32xf32, #tpu.memory_space<vmem>>, %arg6: memref<1x8xf32, #tpu.memory_space<vmem>>) attributes {dimension_semantics = [#tpu.dimension_semantics<arbitrary>], iteration_bounds = array<i64: 1>, scalar_prefetch = 0 : i64, scratch_operands = 0 : i64, tpu.core_type = #tpu.core_type<tc>, window_params = [{pipeline_mode = #tpu.pipeline_mode<synchronous>, transform_indices = @transform_0, window_bounds = array<i64: 1, 32>}, {pipeline_mode = #tpu.pipeline_mode<synchronous>, transform_indices = @transform_1, window_bounds = array<i64: 8, 32>}, {pipeline_mode = #tpu.pipeline_mode<synchronous>, transform_indices = @transform_2, window_bounds = array<i64: 64, 32>}, {pipeline_mode = #tpu.pipeline_mode<synchronous>, transform_indices = @transform_3, window_bounds = array<i64: 1, 32>}, {pipeline_mode = #tpu.pipeline_mode<synchronous>, transform_indices = @transform_4, window_bounds = array<i64: 1, 32>}, {pipeline_mode = #tpu.pipeline_mode<synchronous>, transform_indices = @transform_5, window_bounds = array<i64: 1, 8>}]} {
    %c0 = arith.constant 0 : index
    %c0_0 = arith.constant 0 : index
    %0 = vector.load %arg1[%c0, %c0_0] : memref<1x32xf32, #tpu.memory_space<vmem>>, vector<1x32xf32>
    %c0_1 = arith.constant 0 : index
    %c0_2 = arith.constant 0 : index
    %1 = vector.load %arg2[%c0_1, %c0_2] : memref<8x32xf32, #tpu.memory_space<vmem>>, vector<8x32xf32>
    %c0_3 = arith.constant 0 : index
    %c0_4 = arith.constant 0 : index
    %2 = vector.load %arg3[%c0_3, %c0_4] : memref<64x32xf32, #tpu.memory_space<vmem>>, vector<32x32xf32>
    %cst = arith.constant dense<0.000000e+00> : vector<1x32xf32>
    %3 = tpu.matmul %0, %2, %cst {dimension_numbers = #tpu.dot_dimension_numbers<[1], [0], [0], [1], [0, 0, 1, 1], [], []>} : vector<1x32xf32>, vector<32x32xf32>, vector<1x32xf32> -> vector<1x32xf32>
    %c32 = arith.constant 32 : index
    %c0_5 = arith.constant 0 : index
    %4 = vector.load %arg3[%c32, %c0_5] : memref<64x32xf32, #tpu.memory_space<vmem>>, vector<32x32xf32>
    %cst_6 = arith.constant dense<0.000000e+00> : vector<8x32xf32>
    %5 = tpu.matmul %1, %4, %cst_6 {dimension_numbers = #tpu.dot_dimension_numbers<[1], [0], [0], [1], [0, 0, 1, 1], [], []>} : vector<8x32xf32>, vector<32x32xf32>, vector<8x32xf32> -> vector<8x32xf32>
    %6 = vector.broadcast %3 : vector<1x32xf32> to vector<8x32xf32>
    %7 = arith.addf %6, %5 : vector<8x32xf32>
    %c0_7 = arith.constant 0 : index
    %c0_8 = arith.constant 0 : index
    %8 = vector.load %arg4[%c0_7, %c0_8] : memref<1x32xf32, #tpu.memory_space<vmem>>, vector<1x32xf32>
    %9 = vector.broadcast %8 : vector<1x32xf32> to vector<8x32xf32>
    %10 = arith.addf %7, %9 : vector<8x32xf32>
    %11 = math.tanh %10 : vector<8x32xf32>
    %c0_9 = arith.constant 0 : index
    %c0_10 = arith.constant 0 : index
    %12 = vector.load %arg5[%c0_9, %c0_10] : memref<1x32xf32, #tpu.memory_space<vmem>>, vector<1x32xf32>
    %cst_11 = arith.constant dense<0.000000e+00> : vector<1x8xf32>
    %13 = tpu.matmul %12, %11, %cst_11 {dimension_numbers = #tpu.dot_dimension_numbers<[1], [1], [0], [0], [0, 0, 1, 0], [], []>} : vector<1x32xf32>, vector<8x32xf32>, vector<1x8xf32> -> vector<1x8xf32>
    %cst_12 = arith.constant dense<0xFF800000> : vector<1xf32>
    %14 = vector.multi_reduction <maximumf>, %13, %cst_12 [1] : vector<1x8xf32> to vector<1xf32>
    %15 = vector.shape_cast %14 : vector<1xf32> to vector<1x1xf32>
    %16 = vector.broadcast %15 : vector<1x1xf32> to vector<1x8xf32>
    %17 = arith.subf %13, %16 : vector<1x8xf32>
    %18 = math.exp %17 : vector<1x8xf32>
    %cst_13 = arith.constant dense<0.000000e+00> : vector<1xf32>
    %19 = vector.multi_reduction <add>, %18, %cst_13 [1] : vector<1x8xf32> to vector<1xf32>
    %20 = vector.shape_cast %19 : vector<1xf32> to vector<1x1xf32>
    %21 = vector.broadcast %20 : vector<1x1xf32> to vector<1x8xf32>
    %22 = arith.divf %18, %21 : vector<1x8xf32>
    %c0_14 = arith.constant 0 : index
    %c0_15 = arith.constant 0 : index
    %23 = vector.load %arg6[%c0_14, %c0_15] : memref<1x8xf32, #tpu.memory_space<vmem>>, vector<1x8xf32>
    tpu.vector_store %arg6[%c0_14, %c0_15], %22 {strides = array<i32>} : memref<1x8xf32, #tpu.memory_space<vmem>>, vector<1x8xf32>,
    return
  }
  func.func @transform_0(%arg0: i32) -> (i32, i32) {
    %c0_i32 = arith.constant 0 : i32
    %c0_i32_0 = arith.constant 0 : i32
    %c0_i32_1 = arith.constant 0 : i32
    return %c0_i32, %c0_i32_0 : i32, i32
  }
  func.func @transform_1(%arg0: i32) -> (i32, i32) {
    %c0_i32 = arith.constant 0 : i32
    %c0_i32_0 = arith.constant 0 : i32
    %c0_i32_1 = arith.constant 0 : i32
    return %c0_i32, %c0_i32_0 : i32, i32
  }
  func.func @transform_2(%arg0: i32) -> (i32, i32) {
    %c0_i32 = arith.constant 0 : i32
    %c0_i32_0 = arith.constant 0 : i32
    %c0_i32_1 = arith.constant 0 : i32
    return %c0_i32, %c0_i32_0 : i32, i32
  }
  func.func @transform_3(%arg0: i32) -> (i32, i32) {
    %c0_i32 = arith.constant 0 : i32
    %c0_i32_0 = arith.constant 0 : i32
    %c0_i32_1 = arith.constant 0 : i32
    return %c0_i32, %c0_i32_0 : i32, i32
  }
  func.func @transform_4(%arg0: i32) -> (i32, i32) {
    %c0_i32 = arith.constant 0 : i32
    %c0_i32_0 = arith.constant 0 : i32
    %c0_i32_1 = arith.constant 0 : i32
    return %c0_i32, %c0_i32_0 : i32, i32
  }
  func.func @transform_5(%arg0: i32) -> (i32, i32) {
    %c0_i32 = arith.constant 0 : i32
    %c0_i32_0 = arith.constant 0 : i32
    %c0_i32_1 = arith.constant 0 : i32
    return %c0_i32, %c0_i32_0 : i32, i32
  }
}

</mosaic_0001>

<bundles_post_ra>
// kernel: attention_forward.1
= control target key start
LH: loop header
LB: loop body
LE: loop exit
PB: predicated region body
PF: predicated region fallthrough
CT: control target
= control target key end

     0   :  { %v371_v2 = vmov 0.0   ;;  %s450_s0 = inlined_call_operand.vmem [shape: f32[1,32], index: 0, kind: input, shape index: {}]   ;;  %s451_s1 = inlined_call_operand.vmem [shape: f32[8,32], index: 1, kind: input, shape index: {}]   ;;  %s452_s2 = inlined_call_operand.vmem [shape: f32[64,32], index: 2, kind: input, shape index: {}]   ;;  %s453_s3 = inlined_call_operand.vmem [shape: f32[1,32], index: 3, kind: input, shape index: {}]   ;;  %s454_s4 = inlined_call_operand.vmem [shape: f32[1,32], index: 4, kind: input, shape index: {}]   ;;  %s455_s5 = inlined_call_operand.hbm [shape: f32[1,8], index: 5, kind: output, shape index: {}]  }
   0x1   :  { %v26_v0 = vld [vmem:[%s452_s2 + $0x18] sm:$0xff]  ;;  %313 = vmatprep.subr.mxu0 %v371_v2  ;;  %324 = vmatprep.subr.mxu1 %v371_v2  ;;  %v25_v3 = vld [vmem:[%s452_s2 + $0x10] sm:$0xff]  ;;  %v24_v5 = vld [vmem:[%s452_s2 + $0x8] sm:$0xff] }
   0x2   :  { %v104_v1 = vld [vmem:[%s452_s2 + $0x38] sm:$0xff]  ;;  %v103_v4 = vld [vmem:[%s452_s2 + $0x30] sm:$0xff]  ;;  %314 = vmatpush3.msra.mxu0 %v26_v0  ;;  %v102_v6 = vld [vmem:[%s452_s2 + $0x28] sm:$0xff] }
   0x3   :  { %325 = vmatpush3.msra.mxu1 %v104_v1  ;;  %315 = vmatprep.subr.mxu0 %v371_v2 }
   0x4   :  { %326 = vmatprep.subr.mxu1 %v371_v2 }
   0x5   :  { %10 = vsyncpa [#allocation3], 0  ;;  %316 = vmatpush3.msra.mxu0 %v25_v3  ;;  %327 = vmatpush3.msra.mxu1 %v103_v4  ;;  %v23_v7 = vld [vmem:[%s452_s2] sm:$0xff]  ;;  %vm27_vm0 = vcmask 261120   ;;  %vm372_vm1 = vmmov 0   ;;  %v178_v11 = vlaneseq  ;;  %vm269_vm2 = vcmask 57344  }
   0x6   :  { %317 = vmatprep.subr.mxu0 %v371_v2  ;;  %328 = vmatprep.subr.mxu1 %v371_v2  ;;  %v101_v8 = vld [vmem:[%s452_s2 + $0x20] sm:$0xff] }
   0x7   :  { %318 = vmatpush3.msra.mxu0 %v24_v5  ;;  %329 = vmatpush3.msra.mxu1 %v102_v6  ;;  %v21_v9 = vld [vmem:[%s450_s0] sm:$0x1]  ;;  %v179_v12 = vshrl.u32 %v178_v11, 7 }
   0x8   :  { %319 = vmatprep.subr.mxu0 %v371_v2  ;;  %330 = vmatprep.subr.mxu1 %v371_v2  ;;  %v22_v10 = vld [vmem:[%s451_s1] sm:$0xff] }
   0x9   :  { %320 = vmatpush3.msra.mxu0 %v23_v7  ;;  %321 = vmatprep.mubr.msk.f32.mxu0 %vm372_vm1, %v371_v2  ;;  %v180_v13 = vsub.s32 0, %v179_v12  ;;  %v298_v17 = vld [vmem:[%s453_s3] ss:$0 sm:$0xff]  ;;  %s373_s3 = smov [#allocation2]  }
   0xa   :  { %331 = vmatpush3.msra.mxu1 %v101_v8  ;;  %332 = vmatprep.mubr.msk.f32.mxu1 %vm372_vm1, %v371_v2  ;;  %v192_v23 = vld [vmem:[%s454_s4] sm:$0x1]  ;;  %s288_s4 = sshll.u32 %s373_s3, 4  ;;  %s289_s4 = int_to_ptr.vmem [resolvable:$true] %s288_s4 }
   0xb   :  { %322 = vmatmul.mubr.msk.f32.vlgmr.msra.gmra.mxu0 %vm27_vm0, %v21_v9  ;;  %333 = vmatmul.mubr.msk.f32.vlgmr.msra.gmra.mxu1 %vm27_vm0, %v22_v10  ;;  %s349_s14 = scalar_lea.vmem %s289_s4, 16  ;;  %s353_s15 = scalar_lea.vmem %s289_s4, 32 }
   0xc   :  { %335 = vmatprep.subr.mxu0 %v371_v2  ;;  %337 = vmatprep.mubr.msk.f32.mxu0 %vm372_vm1, %v371_v2  ;;  %p350_p0 = scmp.ne.s32.totalorder %s289_s4, %s349_s14  ;;  %p354_p1 = scmp.lt.s32.totalorder %s289_s4, %s289_s4 }
   0xd   :  { %p355_p2 = scmp.lt.s32.totalorder %s353_s15, %s349_s14 }
   0xf   :  { %p356_p3 = por %p355_p2, %p354_p1 }
  0x11   :  { %p357_p4 = pnand %p356_p3, %p350_p0 }
  0xcb   :  { %v97_v14 = vpop.f32.mrf.mxu0  ;;  %v174_v15 = vpop.f32.mrf.mxu1 }
  0xcc   :  { %v181_v16 = vrot.slane %v97_v14, %v180_v13 }
  0xcd   :  { %v323_v18 = vpop.f32.mrf.mxu0  ;;  %v334_v19 = vpop.f32.mrf.mxu1 }
  0xce   :  { %v182_v20 = vadd.f32 %v181_v16, %v174_v15 }
  0xd0   :  { %v190_v21 = vadd.f32 %v298_v17, %v182_v20 }
  0xd2   :  { %343 = vtanh.f32 %v190_v21 }
  0xdf   :  { %v344_v22 = vpop.eup %343 }
  0xe0   :  { %336 = vmatpush3.xpose.msk.msra.mxu0 %vm27_vm0, %v344_v22 }
  0xe3   :  { %338 = vmatmul.mubr.msk.f32.vlgmr.msra.gmra.mxu0 %vm27_vm0, %v192_v23 }
 0x1a3   :  { %v265_v24 = vpop.f32.mrf.mxu0 }
 0x1a4   :  { %v270_v25 = vsel %vm269_vm2, %v265_v24, -inf }
 0x1a5   :  { %271 = vmax.xlane.f32.xlu0 %v270_v25  ;;  %v339_v26 = vpop.f32.mrf.mxu0 }
 0x22e   :  { %v272_v27 = vpop.xlane.xlu0 %271 }
 0x22f   :  { %v273_v28 = vsub.f32 %v265_v24, %v272_v27 }
 0x231   :  { %v274_v29 = vmul.f32 1.442695, %v273_v28 }
 0x233   :  { %345 = vpow2.f32 %v274_v29 }
 0x240   :  { %v346_v30 = vpop.eup %345 }
 0x241   :  { %v276_v31 = vsel %vm269_vm2, %v346_v30, 0.0 }
 0x242   :  { %277 = vadd.xlane.f32.xlu0 %v276_v31 }
 0x2cb   :  { %v278_v32 = vpop.xlane.xlu0 %277 }
 0x2cc   :  { %347 = vrcp.f32 %v278_v32 }
 0x2d9   :  { %v348_v33 = vpop.eup %347 }
 0x2da   :  { %v280_v34 = vmul.f32 %v348_v33, %v346_v30 }
 0x2dc   :  { %281 = vst.msk [vmem:[#allocation2] sm:$0x1] %vm269_vm2, %v280_v34 }
 0x2dd   :  { %360 = shalt.err (!%p357_p4)
}
 0x2de   :  { %291 = dma.vmem_to_hbm [thread:$0]  %s289_s4, 16, %s455_s5, [#allocation3]  }
 0x2df   :  { %369 = dma.done.wait [#allocation3], 16  }
 0x2e0   :  { %370 = vsyncadd [#allocation3], 4294967280 }
 0x2e1   :  { %295 = vsyncpa [#allocation3], 1 }

</bundles_post_ra>
